<compile_context>
chip_gen: v5e
topology: v5e:2x2
jax: 0.10.0
libtpu: 0.0.40
codegen_flags: <defaults>
</compile_context>

<pallas_src>
import functools

import numpy as np
import jax
import jax.numpy as jnp
from jax.experimental import pallas as pl
from jax.experimental.pallas import tpu as pltpu

KH = KW = 7
STRIDE = 2
PAD = 3
COUT = 64
POOL_K = 3
POOL_S = 2
POOL_P = 1
BN_EPS = 1e-5

VMEM_LIMIT = 32 * 1024 * 1024  # fits default scoped VMEM on v5e/v6e/v7x


def _round_up(x, m):
    return (x + m - 1) // m * m


# ---------------- Pallas kernels ----------------


def _conv_bn_relu_kernel(p_ref, w_ref, scale_ref, bias_ref, o_ref):
    """One M-tile of the im2col GEMM, fused with folded BatchNorm + ReLU.

    p_ref:     (TILE_M, K)    bf16 im2col patches (streamed per grid step)
    w_ref:     (K, COUT)      bf16 weights (same block every step -> resident)
    scale_ref: (1, COUT)      f32 folded BN scale
    bias_ref:  (1, COUT)      f32 folded BN bias
    o_ref:     (TILE_M, COUT) bf16
    """
    acc = jnp.dot(p_ref[...], w_ref[...], preferred_element_type=jnp.float32)
    y = acc * scale_ref[...] + bias_ref[...]          # BN folded: y*scale + bias
    o_ref[...] = jnp.maximum(y, 0.0).astype(o_ref.dtype)


def _maxpool_kernel(y00_ref, y01_ref, y10_ref, y11_ref, o_ref):
    """3x3 stride-2 max pool over one image, from its 2x2 parity phases.

    y??_ref: (1, POH + 1, POW + 1, C) parity phases of the zero-padded input
    o_ref:   (1, POH, POW, C) f32
    """
    ph = o_ref.shape[1]
    pw = o_ref.shape[2]
    # Window element (kh, kw) at output (p, q) lives at padded row 2p+kh,
    # col 2q+kw  ->  phase (kh%2, kw%2), index (p + kh//2, q + kw//2).
    t00 = y00_ref[0, :ph, :pw, :]          # (0, 0)
    t01 = y01_ref[0, :ph, :pw, :]          # (0, 1)
    t02 = y00_ref[0, :ph, 1:pw + 1, :]     # (0, 2)
    t10 = y10_ref[0, :ph, :pw, :]          # (1, 0)
    t11 = y11_ref[0, :ph, :pw, :]          # (1, 1)
    t12 = y10_ref[0, :ph, 1:pw + 1, :]     # (1, 2)
    t20 = y00_ref[0, 1:ph + 1, :pw, :]     # (2, 0)
    t21 = y01_ref[0, 1:ph + 1, :pw, :]     # (2, 1)
    t22 = y00_ref[0, 1:ph + 1, 1:pw + 1, :]  # (2, 2)
    # Pairwise max tree: only a few slabs live in vregs at any time.
    m0 = jnp.maximum(jnp.maximum(t00, t01), jnp.maximum(t02, t10))
    m1 = jnp.maximum(jnp.maximum(t11, t12), jnp.maximum(t20, t21))
    o_ref[0] = jnp.maximum(jnp.maximum(m0, m1), t22).astype(o_ref.dtype)


# ---------------- Wrappers ----------------


def conv1_bn_relu(x_nhwc, w_hwio, scale, bias, *, tile_m=512):
    """conv1 (7x7/s2/p3) + folded BN + ReLU as a tiled bf16 im2col GEMM."""
    N, H, W, Cin = x_nhwc.shape
    OH = (H + 2 * PAD - KH) // STRIDE + 1
    OW = (W + 2 * PAD - KW) // STRIDE + 1
    K = KH * KW * Cin
    M = N * OH * OW

    # im2col glue (indexing only), built directly in bf16 to halve its HBM cost.
    # TODO(synk): build the patches inside the kernel (halo block + 49-tap grid
    # reduction) to eliminate the im2col materialization entirely.
    x_pad = jnp.pad(x_nhwc, ((0, 0), (PAD, PAD), (PAD, PAD), (0, 0)))
    x_pad = x_pad.astype(jnp.bfloat16)
    patches = jnp.stack(
        [x_pad[:, kh:kh + STRIDE * OH:STRIDE, kw:kw + STRIDE * OW:STRIDE, :]
         for kh in range(KH) for kw in range(KW)],
        axis=3,
    ).reshape(M, K)
    w_mat = w_hwio.reshape(K, COUT).astype(jnp.bfloat16)

    # Tile over M; bf16 wants the second-minor block dim to be a multiple of 16.
    tile_m = min(_round_up(tile_m, 16), _round_up(M, 16))
    m_pad = _round_up(M, tile_m)
    if m_pad != M:
        patches = jnp.pad(patches, ((0, m_pad - M), (0, 0)))

    out = pl.pallas_call(
        _conv_bn_relu_kernel,
        out_shape=jax.ShapeDtypeStruct((m_pad, COUT), jnp.bfloat16),
        grid=(m_pad // tile_m,),
        in_specs=[
            pl.BlockSpec((tile_m, K), lambda i: (i, 0)),
            pl.BlockSpec((K, COUT), lambda i: (0, 0)),
            pl.BlockSpec((1, COUT), lambda i: (0, 0)),
            pl.BlockSpec((1, COUT), lambda i: (0, 0)),
        ],
        out_specs=pl.BlockSpec((tile_m, COUT), lambda i: (i, 0)),
        compiler_params=pltpu.CompilerParams(
            dimension_semantics=("parallel",),
            vmem_limit_bytes=VMEM_LIMIT),
    )(patches, w_mat, scale.reshape(1, COUT), bias.reshape(1, COUT))
    return out[:M].reshape(N, OH, OW, COUT)


def maxpool_3x3_s2(y_nhwc):
    """3x3 stride-2 pad-1 max pool (input is post-ReLU, so zero pad is valid)."""
    N, H, W, C = y_nhwc.shape
    POH = (H + 2 * POOL_P - POOL_K) // POOL_S + 1
    POW = (W + 2 * POOL_P - POOL_K) // POOL_S + 1
    pad_b = 2 * POH + 1 - H
    pad_r = 2 * POW + 1 - W
    y_pad = jnp.pad(y_nhwc, ((0, 0), (POOL_P, pad_b), (POOL_P, pad_r), (0, 0)))
    # 2x2 parity-phase split: a 1x reorganization instead of 9x window slabs.
    y00 = y_pad[:, 0::2, 0::2, :]
    y01 = y_pad[:, 0::2, 1::2, :]
    y10 = y_pad[:, 1::2, 0::2, :]
    y11 = y_pad[:, 1::2, 1::2, :]
    phase_spec = pl.BlockSpec((1, POH + 1, POW + 1, C), lambda n: (n, 0, 0, 0))

    out = pl.pallas_call(
        _maxpool_kernel,
        out_shape=jax.ShapeDtypeStruct((N, POH, POW, C), jnp.float32),
        grid=(N,),
        in_specs=[phase_spec] * 4,
        out_specs=pl.BlockSpec((1, POH, POW, C), lambda n: (n, 0, 0, 0)),
        compiler_params=pltpu.CompilerParams(
            dimension_semantics=("parallel",),
            vmem_limit_bytes=VMEM_LIMIT),
    )(y00, y01, y10, y11)
    return out


def visible_module_forward(x_nchw, conv_w_oihw, gamma, beta,
                           running_mean, running_var, *, tile_m=512):
    """share_net=1 path of visible_module.forward (BatchNorm in eval mode)."""
    x_nhwc = jnp.transpose(x_nchw, (0, 2, 3, 1))
    w_hwio = jnp.transpose(conv_w_oihw, (2, 3, 1, 0))        # OIHW -> HWIO
    scale = gamma / jnp.sqrt(running_var + BN_EPS)            # fold BN (f32)
    bias = beta - running_mean * scale
    y = conv1_bn_relu(x_nhwc, w_hwio, scale, bias, tile_m=tile_m)
    # TODO(synk): fuse the maxpool into the conv epilogue so the full conv
    # activation never round-trips through HBM.
    y = maxpool_3x3_s2(y)
    return jnp.transpose(y, (0, 3, 1, 2))                     # back to NCHW


# ---------------- Plain-JAX reference for verification ----------------


def reference_forward(x_nchw, conv_w_oihw, gamma, beta, running_mean, running_var):
    x = jnp.transpose(x_nchw, (0, 2, 3, 1))
    w = jnp.transpose(conv_w_oihw, (2, 3, 1, 0))
    y = jax.lax.conv_general_dilated(
        x, w, window_strides=(STRIDE, STRIDE), padding=((PAD, PAD), (PAD, PAD)),
        dimension_numbers=("NHWC", "HWIO", "NHWC"),
        precision=jax.lax.Precision.HIGHEST)
    y = (y - running_mean) / jnp.sqrt(running_var + BN_EPS) * gamma + beta
    y = jnp.maximum(y, 0.0)
    y = jax.lax.reduce_window(
        y, -jnp.inf, jax.lax.max,
        window_dimensions=(1, POOL_K, POOL_K, 1),
        window_strides=(1, POOL_S, POOL_S, 1),
        padding=((0, 0), (POOL_P, POOL_P), (POOL_P, POOL_P), (0, 0)))
    return jnp.transpose(y, (0, 3, 1, 2))


if __name__ == "__main__":
    key = jax.random.PRNGKey(0)
    kx, kw, kg, kb, km, kv = jax.random.split(key, 6)

    N, Cin, H, W = 2, 3, 32, 32
    x = jax.random.normal(kx, (N, Cin, H, W), jnp.float32)

    # Deterministic synthetic parameters (shapes from resnet50 conv1/bn1)
    conv_w = jax.random.normal(kw, (COUT, Cin, KH, KW), jnp.float32) / np.sqrt(KH * KW * Cin)
    gamma = jax.random.uniform(kg, (COUT,), jnp.float32, 0.5, 1.5)
    beta = 0.1 * jax.random.normal(kb, (COUT,), jnp.float32)
    running_mean = 0.1 * jax.random.normal(km, (COUT,), jnp.float32)
    running_var = jax.random.uniform(kv, (COUT,), jnp.float32, 0.5, 1.5)

    # tile_m=128 exercises a multi-step (pipelined) grid at this toy size;
    # for real ResNet-50 stem shapes sweep tile_m in the 512-2048 range.
    fwd = jax.jit(functools.partial(visible_module_forward, tile_m=128))
    out = jax.block_until_ready(fwd(x, conv_w, gamma, beta, running_mean, running_var))
    assert out.shape == (N, COUT, 8, 8), out.shape

    ref = jax.block_until_ready(
        reference_forward(x, conv_w, gamma, beta, running_mean, running_var))
    # Tolerance sized for intentional bf16 GEMM operands / bf16 conv activation
    # (accumulation is f32); a pure-f32 pipeline would pass at ~1e-5.
    np.testing.assert_allclose(np.asarray(out), np.asarray(ref), rtol=4e-2, atol=4e-2)

    print("KERNEL_OK")
</pallas_src>

<mosaic_0001>
module attributes {stable_mosaic.version = 11 : i64} {
  func.func @_conv_bn_relu_kernel(%arg0: i32, %arg1: memref<128x147xbf16, #tpu.memory_space<vmem>>, %arg2: memref<147x64xbf16, #tpu.memory_space<vmem>>, %arg3: memref<1x64xf32, #tpu.memory_space<vmem>>, %arg4: memref<1x64xf32, #tpu.memory_space<vmem>>, %arg5: memref<128x64xbf16, #tpu.memory_space<vmem>>) attributes {dimension_semantics = [#tpu.dimension_semantics<parallel>], iteration_bounds = array<i64: 4>, scalar_prefetch = 0 : i64, scratch_operands = 0 : i64, tpu.core_type = #tpu.core_type<tc>, window_params = [{transform_indices = @transform_0, window_bounds = array<i64: 128, 147>}, {pipeline_mode = #tpu.pipeline_mode<synchronous>, transform_indices = @transform_1, window_bounds = array<i64: 147, 64>}, {pipeline_mode = #tpu.pipeline_mode<synchronous>, transform_indices = @transform_2, window_bounds = array<i64: 1, 64>}, {pipeline_mode = #tpu.pipeline_mode<synchronous>, transform_indices = @transform_3, window_bounds = array<i64: 1, 64>}, {transform_indices = @transform_4, window_bounds = array<i64: 128, 64>}]} {
    %c0 = arith.constant 0 : index
    %c0_0 = arith.constant 0 : index
    %0 = vector.load %arg1[%c0, %c0_0] : memref<128x147xbf16, #tpu.memory_space<vmem>>, vector<128x147xbf16>
    %c0_1 = arith.constant 0 : index
    %c0_2 = arith.constant 0 : index
    %1 = vector.load %arg2[%c0_1, %c0_2] : memref<147x64xbf16, #tpu.memory_space<vmem>>, vector<147x64xbf16>
    %cst = arith.constant dense<0.000000e+00> : vector<128x64xf32>
    %2 = tpu.matmul %0, %1, %cst {dimension_numbers = #tpu.dot_dimension_numbers<[1], [0], [0], [1], [0, 0, 1, 1], [], []>} : vector<128x147xbf16>, vector<147x64xbf16>, vector<128x64xf32> -> vector<128x64xf32>
    %c0_3 = arith.constant 0 : index
    %c0_4 = arith.constant 0 : index
    %3 = vector.load %arg3[%c0_3, %c0_4] : memref<1x64xf32, #tpu.memory_space<vmem>>, vector<1x64xf32>
    %4 = vector.broadcast %3 : vector<1x64xf32> to vector<128x64xf32>
    %5 = arith.mulf %2, %4 : vector<128x64xf32>
    %c0_5 = arith.constant 0 : index
    %c0_6 = arith.constant 0 : index
    %6 = vector.load %arg4[%c0_5, %c0_6] : memref<1x64xf32, #tpu.memory_space<vmem>>, vector<1x64xf32>
    %7 = vector.broadcast %6 : vector<1x64xf32> to vector<128x64xf32>
    %8 = arith.addf %5, %7 : vector<128x64xf32>
    %cst_7 = arith.constant 0.000000e+00 : f32
    %9 = vector.broadcast %cst_7 : f32 to vector<128x64xf32>
    %10 = arith.maximumf %8, %9 : vector<128x64xf32>
    %11 = arith.truncf %10 : vector<128x64xf32> to vector<128x64xbf16>
    %c0_8 = arith.constant 0 : index
    %c0_9 = arith.constant 0 : index
    %12 = vector.load %arg5[%c0_8, %c0_9] : memref<128x64xbf16, #tpu.memory_space<vmem>>, vector<128x64xbf16>
    tpu.vector_store %arg5[%c0_8, %c0_9], %11 {strides = array<i32>} : memref<128x64xbf16, #tpu.memory_space<vmem>>, vector<128x64xbf16>,
    return
  }
  func.func @transform_0(%arg0: i32) -> (i32, i32) {
    %c0_i32 = arith.constant 0 : i32
    %c0_i32_0 = arith.constant 0 : i32
    return %arg0, %c0_i32 : i32, i32
  }
  func.func @transform_1(%arg0: i32) -> (i32, i32) {
    %c0_i32 = arith.constant 0 : i32
    %c0_i32_0 = arith.constant 0 : i32
    %c0_i32_1 = arith.constant 0 : i32
    return %c0_i32, %c0_i32_0 : i32, i32
  }
  func.func @transform_2(%arg0: i32) -> (i32, i32) {
    %c0_i32 = arith.constant 0 : i32
    %c0_i32_0 = arith.constant 0 : i32
    %c0_i32_1 = arith.constant 0 : i32
    return %c0_i32, %c0_i32_0 : i32, i32
  }
  func.func @transform_3(%arg0: i32) -> (i32, i32) {
    %c0_i32 = arith.constant 0 : i32
    %c0_i32_0 = arith.constant 0 : i32
    %c0_i32_1 = arith.constant 0 : i32
    return %c0_i32, %c0_i32_0 : i32, i32
  }
  func.func @transform_4(%arg0: i32) -> (i32, i32) {
    %c0_i32 = arith.constant 0 : i32
    %c0_i32_0 = arith.constant 0 : i32
    return %arg0, %c0_i32 : i32, i32
  }
}

module attributes {stable_mosaic.version = 11 : i64} {
  func.func @_maxpool_kernel(%arg0: i32, %arg1: memref<1x9x9x64xbf16, #tpu.memory_space<vmem>>, %arg2: memref<1x9x9x64xbf16, #tpu.memory_space<vmem>>, %arg3: memref<1x9x9x64xbf16, #tpu.memory_space<vmem>>, %arg4: memref<1x9x9x64xbf16, #tpu.memory_space<vmem>>, %arg5: memref<1x8x8x64xf32, #tpu.memory_space<vmem>>) attributes {dimension_semantics = [#tpu.dimension_semantics<parallel>], iteration_bounds = array<i64: 2>, scalar_prefetch = 0 : i64, scratch_operands = 0 : i64, tpu.core_type = #tpu.core_type<tc>, window_params = [{transform_indices = @transform_0, window_bounds = array<i64: 1, 9, 9, 64>}, {transform_indices = @transform_1, window_bounds = array<i64: 1, 9, 9, 64>}, {transform_indices = @transform_2, window_bounds = array<i64: 1, 9, 9, 64>}, {transform_indices = @transform_3, window_bounds = array<i64: 1, 9, 9, 64>}, {transform_indices = @transform_4, window_bounds = array<i64: 1, 8, 8, 64>}]} {
    %c0 = arith.constant 0 : index
    %c0_0 = arith.constant 0 : index
    %c0_1 = arith.constant 0 : index
    %c0_2 = arith.constant 0 : index
    %0 = vector.load %arg1[%c0, %c0_0, %c0_1, %c0_2] : memref<1x9x9x64xbf16, #tpu.memory_space<vmem>>, vector<1x8x8x64xbf16>
    %1 = vector.shape_cast %0 : vector<1x8x8x64xbf16> to vector<8x8x64xbf16>
    %c0_3 = arith.constant 0 : index
    %c0_4 = arith.constant 0 : index
    %c0_5 = arith.constant 0 : index
    %c0_6 = arith.constant 0 : index
    %2 = vector.load %arg2[%c0_3, %c0_4, %c0_5, %c0_6] : memref<1x9x9x64xbf16, #tpu.memory_space<vmem>>, vector<1x8x8x64xbf16>
    %3 = vector.shape_cast %2 : vector<1x8x8x64xbf16> to vector<8x8x64xbf16>
    %c0_7 = arith.constant 0 : index
    %c0_8 = arith.constant 0 : index
    %c1 = arith.constant 1 : index
    %c0_9 = arith.constant 0 : index
    %4 = vector.load %arg1[%c0_7, %c0_8, %c1, %c0_9] : memref<1x9x9x64xbf16, #tpu.memory_space<vmem>>, vector<1x8x8x64xbf16>
    %5 = vector.shape_cast %4 : vector<1x8x8x64xbf16> to vector<8x8x64xbf16>
    %c0_10 = arith.constant 0 : index
    %c0_11 = arith.constant 0 : index
    %c0_12 = arith.constant 0 : index
    %c0_13 = arith.constant 0 : index
    %6 = vector.load %arg3[%c0_10, %c0_11, %c0_12, %c0_13] : memref<1x9x9x64xbf16, #tpu.memory_space<vmem>>, vector<1x8x8x64xbf16>
    %7 = vector.shape_cast %6 : vector<1x8x8x64xbf16> to vector<8x8x64xbf16>
    %c0_14 = arith.constant 0 : index
    %c0_15 = arith.constant 0 : index
    %c0_16 = arith.constant 0 : index
    %c0_17 = arith.constant 0 : index
    %8 = vector.load %arg4[%c0_14, %c0_15, %c0_16, %c0_17] : memref<1x9x9x64xbf16, #tpu.memory_space<vmem>>, vector<1x8x8x64xbf16>
    %9 = vector.shape_cast %8 : vector<1x8x8x64xbf16> to vector<8x8x64xbf16>
    %c0_18 = arith.constant 0 : index
    %c0_19 = arith.constant 0 : index
    %c1_20 = arith.constant 1 : index
    %c0_21 = arith.constant 0 : index
    %10 = vector.load %arg3[%c0_18, %c0_19, %c1_20, %c0_21] : memref<1x9x9x64xbf16, #tpu.memory_space<vmem>>, vector<1x8x8x64xbf16>
    %11 = vector.shape_cast %10 : vector<1x8x8x64xbf16> to vector<8x8x64xbf16>
    %c0_22 = arith.constant 0 : index
    %c1_23 = arith.constant 1 : index
    %c0_24 = arith.constant 0 : index
    %c0_25 = arith.constant 0 : index
    %12 = vector.load %arg1[%c0_22, %c1_23, %c0_24, %c0_25] : memref<1x9x9x64xbf16, #tpu.memory_space<vmem>>, vector<1x8x8x64xbf16>
    %13 = vector.shape_cast %12 : vector<1x8x8x64xbf16> to vector<8x8x64xbf16>
    %c0_26 = arith.constant 0 : index
    %c1_27 = arith.constant 1 : index
    %c0_28 = arith.constant 0 : index
    %c0_29 = arith.constant 0 : index
    %14 = vector.load %arg2[%c0_26, %c1_27, %c0_28, %c0_29] : memref<1x9x9x64xbf16, #tpu.memory_space<vmem>>, vector<1x8x8x64xbf16>
    %15 = vector.shape_cast %14 : vector<1x8x8x64xbf16> to vector<8x8x64xbf16>
    %c0_30 = arith.constant 0 : index
    %c1_31 = arith.constant 1 : index
    %c1_32 = arith.constant 1 : index
    %c0_33 = arith.constant 0 : index
    %16 = vector.load %arg1[%c0_30, %c1_31, %c1_32, %c0_33] : memref<1x9x9x64xbf16, #tpu.memory_space<vmem>>, vector<1x8x8x64xbf16>
    %17 = vector.shape_cast %16 : vector<1x8x8x64xbf16> to vector<8x8x64xbf16>
    %18 = arith.maximumf %1, %3 : vector<8x8x64xbf16>
    %19 = arith.maximumf %5, %7 : vector<8x8x64xbf16>
    %20 = arith.maximumf %18, %19 : vector<8x8x64xbf16>
    %21 = arith.maximumf %9, %11 : vector<8x8x64xbf16>
    %22 = arith.maximumf %13, %15 : vector<8x8x64xbf16>
    %23 = arith.maximumf %21, %22 : vector<8x8x64xbf16>
    %24 = arith.maximumf %20, %23 : vector<8x8x64xbf16>
    %25 = arith.maximumf %24, %17 : vector<8x8x64xbf16>
    %26 = arith.extf %25 : vector<8x8x64xbf16> to vector<8x8x64xf32>
    %c0_34 = arith.constant 0 : index
    %c0_35 = arith.constant 0 : index
    %c0_36 = arith.constant 0 : index
    %c0_37 = arith.constant 0 : index
    %27 = vector.load %arg5[%c0_34, %c0_35, %c0_36, %c0_37] : memref<1x8x8x64xf32, #tpu.memory_space<vmem>>, vector<1x8x8x64xf32>
    %28 = vector.shape_cast %27 : vector<1x8x8x64xf32> to vector<8x8x64xf32>
    %29 = vector.shape_cast %26 : vector<8x8x64xf32> to vector<1x8x8x64xf32>
    tpu.vector_store %arg5[%c0_34, %c0_35, %c0_36, %c0_37], %29 {strides = array<i32>} : memref<1x8x8x64xf32, #tpu.memory_space<vmem>>, vector<1x8x8x64xf32>,
    return
  }
  func.func @transform_0(%arg0: i32) -> (i32, i32, i32, i32) {
    %c0_i32 = arith.constant 0 : i32
    %c0_i32_0 = arith.constant 0 : i32
    %c0_i32_1 = arith.constant 0 : i32
    %c0_i32_2 = arith.constant 0 : i32
    return %arg0, %c0_i32, %c0_i32_0, %c0_i32_1 : i32, i32, i32, i32
  }
  func.func @transform_1(%arg0: i32) -> (i32, i32, i32, i32) {
    %c0_i32 = arith.constant 0 : i32
    %c0_i32_0 = arith.constant 0 : i32
    %c0_i32_1 = arith.constant 0 : i32
    %c0_i32_2 = arith.constant 0 : i32
    return %arg0, %c0_i32, %c0_i32_0, %c0_i32_1 : i32, i32, i32, i32
  }
  func.func @transform_2(%arg0: i32) -> (i32, i32, i32, i32) {
    %c0_i32 = arith.constant 0 : i32
    %c0_i32_0 = arith.constant 0 : i32
    %c0_i32_1 = arith.constant 0 : i32
    %c0_i32_2 = arith.constant 0 : i32
    return %arg0, %c0_i32, %c0_i32_0, %c0_i32_1 : i32, i32, i32, i32
  }
  func.func @transform_3(%arg0: i32) -> (i32, i32, i32, i32) {
    %c0_i32 = arith.constant 0 : i32
    %c0_i32_0 = arith.constant 0 : i32
    %c0_i32_1 = arith.constant 0 : i32
    %c0_i32_2 = arith.constant 0 : i32
    return %arg0, %c0_i32, %c0_i32_0, %c0_i32_1 : i32, i32, i32, i32
  }
  func.func @transform_4(%arg0: i32) -> (i32, i32, i32, i32) {
    %c0_i32 = arith.constant 0 : i32
    %c0_i32_0 = arith.constant 0 : i32
    %c0_i32_1 = arith.constant 0 : i32
    %c0_i32_2 = arith.constant 0 : i32
    return %arg0, %c0_i32, %c0_i32_0, %c0_i32_1 : i32, i32, i32, i32
  }
}

</mosaic_0001>

<bundles_post_ra>
// kernel: visible_module_forward.2
= control target key start
LH: loop header
LB: loop body
LE: loop exit
PB: predicated region body
PF: predicated region fallthrough
CT: control target
= control target key end

     0   :  { %s845_s15 = smov 0   ;;  %s1020_s0 = inlined_call_operand.vmem [shape: bf16[512,147], index: 0, kind: input, shape index: {}]   ;;  %s1021_s1 = inlined_call_operand.vmem [shape: bf16[147,64], index: 1, kind: input, shape index: {}]   ;;  %s1022_s2 = inlined_call_operand.vmem [shape: f32[1,64], index: 2, kind: input, shape index: {}]   ;;  %s1023_s3 = inlined_call_operand.vmem [shape: f32[1,64], index: 3, kind: input, shape index: {}]   ;;  %s1024_s4 = inlined_call_operand.vmem [shape: bf16[512,64], index: 4, kind: output, shape index: {}]  }
   0x1 LB: > { %s644_s16 = sadd.s32 4294967295, %s817_s15   ;;  %p648_p0 = scmp.ge.s32.totalorder %s817_s15, 1  ;;  %s817_s15 = sphi %s845_s15, %s14_s15  }
   0x2   : > { %p164_p1 = scmp.lt.s32.totalorder %s817_s15, 5 }
   0x4   : > { %p165_p2 = pnand %p648_p0, %p164_p1 }
   0x5   : > { %s649_s21 = sshll.u32 (!%p165_p2), %s644_s16, 4 }
   0x6   : > { %168 = sbr.rel (%p165_p2) target bundleno = 242 (0xf2), region = 36  ;;  %p192_p3 = scmp.lt.s32.totalorder (!%p165_p2), %s649_s21, 63 }
   0xb   : > { %v788_v0 = vld [vmem:[%s1021_s1 + $0x38] sm:$0xff]  ;;  %v239_v1 = vld [vmem:[%s1021_s1 + $0x48] sm:$0x3]  ;;  %vm394_vm0 = vcmask 1040384   ;;  %vm395_vm1 = vcmask 1041408   ;;  %v787_v3 = vld [vmem:[%s1021_s1 + $0x30] sm:$0xff] }
   0xc   : > { %v349_v2 = vunpack.c.l.b16 %v239_v1  ;;  %401 = vmatpush.bf16.msra.mxu0 %v788_v0  ;;  %790 = vmatpush.bf16.msra.mxu2 %v788_v0  ;;  %v819_v4 = vmov 65535   ;;  %s1026_s21 = smov (!%p192_p3, %s649_s21), 63  ;;  %v786_v9 = vld [vmem:[%s1021_s1 + $0x28] sm:$0xff]  ;;  %v789_v10 = vld [vmem:[%s1021_s1 + $0x40] sm:$0xff]  ;;  %vm369_vm2 = vcmask 154624   ;;  %v784_v18 = vld [vmem:[%s1021_s1 + $0x18] sm:$0xff] }
   0xd   : > { %v396_v5 = vsel %vm394_vm0, 4294967295, %v819_v4  ;;  %s764_s26 = sshll.u32 %s1026_s21, 3  ;;  %v785_v14 = vld [vmem:[%s1021_s1 + $0x20] sm:$0xff]  ;;  %v783_v19 = vld [vmem:[%s1021_s1 + $0x10] sm:$0xff]  ;;  %v782_v20 = vld [vmem:[%s1021_s1 + $0x8] sm:$0xff]  ;;  %s653_s22 = sshll.u32 %s1026_s21, 2 }
   0xe   : > { %v359_v6 = vpack.c.b16 %v349_v2, %v349_v2  ;;  %v397_v7 = vsel %vm395_vm1, %v396_v5, 0  ;;  %s874_s5 = scalar_lea.vmem %s1020_s0, %s764_s26  ;;  %v781_v26 = vld [vmem:[%s1021_s1] sm:$0xff]  ;;  %s949_s25 = scalar_lea.vmem %s1024_s4, %s653_s22  ;;  %vm571_vm3 = vcmask 519168  }
   0xf   : > { %v765_v11 = vld [vmem:[%s874_s5 + $0x4] sm:$0xf]  ;;  %v658_v12 = vld [vmem:[%s874_s5 + $0x8] sm:$0xf0]  ;;  %v775_v15 = vld [vmem:[%s874_s5 + $0x54] sm:$0xf] }
  0x10   : > { %v399_v8 = vand.u32 %v397_v7, %v359_v6  ;;  %402 = vmatpush.bf16.msra.mxu0 %v787_v3  ;;  %791 = vmatpush.bf16.msra.mxu2 %v787_v3  ;;  %v661_v13 = vor.u32 %v765_v11, %v658_v12  ;;  %v698_v16 = vld [vmem:[%s874_s5 + $0x58] sm:$0xf0]  ;;  %v767_v21 = vld [vmem:[%s874_s5 + $0x14] sm:$0xf]  ;;  %v777_v23 = vld [vmem:[%s874_s5 + $0x64] sm:$0xf] }
  0x11   : > { %v701_v17 = vor.u32 %v775_v15, %v698_v16  ;;  %v666_v22 = vld [vmem:[%s874_s5 + $0x18] sm:$0xf0]  ;;  %v706_v24 = vld [vmem:[%s874_s5 + $0x68] sm:$0xf0]  ;;  %v656_v27 = vld [vmem:[%s874_s5] sm:$0xf] }
  0x12   : > { %456 = vmatpush.bf16.msra.mxu1 %v399_v8  ;;  %798 = vmatpush.bf16.msra.mxu3 %v399_v8  ;;  %v669_v25 = vor.u32 %v767_v21, %v666_v22  ;;  %v766_v28 = vld [vmem:[%s874_s5 + $0x4] sm:$0xf0]  ;;  %v688_v29 = vld [vmem:[%s874_s5 + $0x40] sm:$0xf]  ;;  %v709_v31 = vor.u32 %v777_v23, %v706_v24  ;;  %v769_v34 = vld [vmem:[%s874_s5 + $0x24] sm:$0xf] }
  0x13   : > { %v774_v30 = vld [vmem:[%s874_s5 + $0x44] sm:$0xf0]  ;;  %v657_v32 = vor.u32 %v766_v28, %v656_v27  ;;  %v674_v35 = vld [vmem:[%s874_s5 + $0x28] sm:$0xf0]  ;;  %v779_v36 = vld [vmem:[%s874_s5 + $0x74] sm:$0xf] }
  0x14   : > { %403 = vmatpush.bf16.msra.mxu0 %v786_v9  ;;  %792 = vmatpush.bf16.msra.mxu2 %v786_v9  ;;  %v689_v33 = vor.u32 %v774_v30, %v688_v29  ;;  %v714_v37 = vld [vmem:[%s874_s5 + $0x78] sm:$0xf0]  ;;  %v677_v38 = vor.u32 %v769_v34, %v674_v35  ;;  %v664_v39 = vld [vmem:[%s874_s5 + $0x10] sm:$0xf]  ;;  %v768_v40 = vld [vmem:[%s874_s5 + $0x14] sm:$0xf0] }
  0x15   : > { %v696_v41 = vld [vmem:[%s874_s5 + $0x50] sm:$0xf]  ;;  %v776_v42 = vld [vmem:[%s874_s5 + $0x54] sm:$0xf0]  ;;  %v717_v43 = vor.u32 %v779_v36, %v714_v37  ;;  %v665_v44 = vor.u32 %v768_v40, %v664_v39  ;;  %v771_v46 = vld [vmem:[%s874_s5 + $0x34] sm:$0xf] }
  0x16   : > { %457 = vmatpush.bf16.msra.mxu1 %v789_v10  ;;  %799 = vmatpush.bf16.msra.mxu3 %v789_v10  ;;  %v697_v45 = vor.u32 %v776_v42, %v696_v41  ;;  %v682_v47 = vld [vmem:[%s874_s5 + $0x38] sm:$0xf0]  ;;  %v672_v49 = vld [vmem:[%s874_s5 + $0x20] sm:$0xf]  ;;  %v770_v50 = vld [vmem:[%s874_s5 + $0x24] sm:$0xf0] }
  0x17   : > { %v685_v48 = vor.u32 %v771_v46, %v682_v47  ;;  %v704_v51 = vld [vmem:[%s874_s5 + $0x60] sm:$0xf]  ;;  %v778_v52 = vld [vmem:[%s874_s5 + $0x64] sm:$0xf0]  ;;  %v673_v53 = vor.u32 %v770_v50, %v672_v49  ;;  %v773_v55 = vld [vmem:[%s874_s5 + $0x44] sm:$0xf] }
  0x18   : > { %404 = vmatpush.bf16.msra.mxu0 %v785_v14  ;;  %793 = vmatpush.bf16.msra.mxu2 %v785_v14  ;;  %v705_v54 = vor.u32 %v778_v52, %v704_v51  ;;  %v690_v56 = vld [vmem:[%s874_s5 + $0x48] sm:$0xf0]  ;;  %v680_v58 = vld [vmem:[%s874_s5 + $0x30] sm:$0xf]  ;;  %v772_v59 = vld [vmem:[%s874_s5 + $0x34] sm:$0xf0] }
  0x19   : > { %754 = vmatmul.msk.bf16.vlgmr.msra.gmra.mxu1 %vm369_vm2, %v661_v13  ;;  %759 = vmatmul.msk.bf16.vlgmr.msra.gmra.mxu3 %vm369_vm2, %v701_v17  ;;  %v693_v57 = vor.u32 %v773_v55, %v690_v56  ;;  %v712_v60 = vld [vmem:[%s874_s5 + $0x70] sm:$0xf]  ;;  %v780_v61 = vld [vmem:[%s874_s5 + $0x74] sm:$0xf0]  ;;  %v681_v62 = vor.u32 %v772_v59, %v680_v58  ;;  %v934_v3 = vld [vmem:[%s1022_s2] ss:$0 sm:$0xff] }
  0x1a   : > { %v713_v63 = vor.u32 %v780_v61, %v712_v60  ;;  %v939_v6 = vld [vmem:[%s1023_s3] ss:$0 sm:$0xff] }
  0x1c   : > { %405 = vmatpush.bf16.msra.mxu0 %v784_v18  ;;  %794 = vmatpush.bf16.msra.mxu2 %v784_v18 }
  0x20   : > { %406 = vmatpush.bf16.msra.mxu0 %v783_v19  ;;  %795 = vmatpush.bf16.msra.mxu2 %v783_v19 }
  0x24   : > { %407 = vmatpush.bf16.msra.mxu0 %v782_v20  ;;  %796 = vmatpush.bf16.msra.mxu2 %v782_v20 }
  0x28   : > { %408 = vmatpush.bf16.msra.mxu0 %v781_v26  ;;  %797 = vmatpush.bf16.msra.mxu2 %v781_v26 }
  0x29   : > { %755 = vmatmul.msk.bf16.gmra.mxu1 %vm369_vm2, %v669_v25  ;;  %760 = vmatmul.msk.bf16.gmra.mxu3 %vm369_vm2, %v709_v31 }
  0x2b   : > { %409 = vmatmul.bf16.vlgmr.msra.gmra.mxu0 %v657_v32  ;;  %429 = vmatmul.bf16.vlgmr.msra.gmra.mxu2 %v689_v33 }
  0x39   : > { %756 = vmatmul.msk.bf16.gmra.mxu1 %vm369_vm2, %v677_v38  ;;  %761 = vmatmul.msk.bf16.gmra.mxu3 %vm369_vm2, %v717_v43 }
  0x3b   : > { %414 = vmatmul.bf16.gmra.mxu0 %v665_v44  ;;  %434 = vmatmul.bf16.gmra.mxu2 %v697_v45 }
  0x49   : > { %757 = vmatmul.msk.bf16.gmra.mxu1 %vm369_vm2, %v685_v48 }
  0x4b   : > { %419 = vmatmul.bf16.gmra.mxu0 %v673_v53  ;;  %439 = vmatmul.bf16.gmra.mxu2 %v705_v54 }
  0x59   : > { %758 = vmatmul.msk.bf16.gmra.mxu1 %vm369_vm2, %v693_v57 }
  0x5b   : > { %424 = vmatmul.bf16.gmra.mxu0 %v681_v62  ;;  %444 = vmatmul.bf16.gmra.mxu2 %v713_v63 }
  0x96   : > { %v459_v0 = vpop.f32.mrf.mxu1 }
  0x9c   : > { %v484_v18 = vpop.f32.mrf.mxu3 }
  0x9e   : > { %v461_v1 = vpop.f32.mrf.mxu1 }
  0xa4   : > { %v486_v29 = vpop.f32.mrf.mxu3 }
  0xa6   : > { %v464_v2 = vpop.f32.mrf.mxu1 }
  0xa8   : > { %v410_v4 = vpop.f32.mrf.mxu0 }
  0xa9   : > { %v460_v5 = vadd.f32 %v459_v0, %v410_v4 }
  0xab   : > { %v503_v7 = vmul.f32 %v934_v3, %v460_v5 }
  0xac   : > { %v489_v46 = vpop.f32.mrf.mxu3 }
  0xad   : > { %v523_v8 = vadd.f32 %v939_v6, %v503_v7 }
  0xae   : > { %v466_v9 = vpop.f32.mrf.mxu1  ;;  %v944_v11 = vpop.f32.mrf.mxu2 }
  0xaf   : > { %v539_v10 = vmax.f32 %v523_v8, 0.0 }
  0xb0   : > { %v412_v12 = vpop.f32.mrf.mxu0 }
  0xb1   : > { %v555_v13 = vpack.c.bf16 %v539_v10, %v539_v10  ;;  %v462_v14 = vadd.f32 %v461_v1, %v412_v12 }
  0xb3   : > { %572 = vst.msk [vmem:[%s949_s25] sm:$0xf] %vm571_vm3, %v555_v13  ;;  %v504_v15 = vmul.f32 %v934_v3, %v462_v14 }
  0xb4   : > { %v491_v62 = vpop.f32.mrf.mxu3 }
  0xb5   : > { %v524_v16 = vadd.f32 %v939_v6, %v504_v15 }
  0xb6   : > { %v469_v17 = vpop.f32.mrf.mxu1  ;;  %v955_v20 = vpop.f32.mrf.mxu2 }
  0xb7   : > { %v540_v19 = vmax.f32 %v524_v16, 0.0 }
  0xb8   : > { %v415_v21 = vpop.f32.mrf.mxu0 }
  0xb9   : > { %v556_v22 = vpack.c.bf16 %v540_v19, %v540_v19  ;;  %v465_v23 = vadd.f32 %v464_v2, %v415_v21 }
  0xbb   : > { %573 = vst.msk [vmem:[%s949_s25 + $0x4] sm:$0xf] %vm571_vm3, %v556_v22  ;;  %v505_v24 = vmul.f32 %v934_v3, %v465_v23 }
  0xbc   : > { %v494_v21 = vpop.f32.mrf.mxu3 }
  0xbd   : > { %v525_v25 = vadd.f32 %v939_v6, %v505_v24 }
  0xbe   : > { %v471_v26 = vpop.f32.mrf.mxu1  ;;  %v435_v28 = vpop.f32.mrf.mxu2 }
  0xbf   : > { %v541_v27 = vmax.f32 %v525_v25, 0.0  ;;  %v485_v30 = vadd.f32 %v484_v18, %v435_v28 }
  0xc0   : > { %v417_v31 = vpop.f32.mrf.mxu0 }
  0xc1   : > { %v557_v32 = vpack.c.bf16 %v541_v27, %v541_v27  ;;  %v467_v33 = vadd.f32 %v466_v9, %v417_v31  ;;  %v513_v34 = vmul.f32 %v934_v3, %v485_v30 }
  0xc3   : > { %574 = vst.msk [vmem:[%s949_s25 + $0x8] sm:$0xf] %vm571_vm3, %v557_v32  ;;  %v506_v35 = vmul.f32 %v934_v3, %v467_v33  ;;  %v533_v36 = vadd.f32 %v939_v6, %v513_v34 }
  0xc5   : > { %v526_v37 = vadd.f32 %v939_v6, %v506_v35  ;;  %v549_v39 = vmax.f32 %v533_v36, 0.0 }
  0xc6   : > { %v474_v38 = vpop.f32.mrf.mxu1  ;;  %v437_v41 = vpop.f32.mrf.mxu2 }
  0xc7   : > { %v542_v40 = vmax.f32 %v526_v37, 0.0  ;;  %v565_v42 = vpack.c.bf16 %v549_v39, %v549_v39  ;;  %v487_v43 = vadd.f32 %v486_v29, %v437_v41 }
  0xc8   : > { %v420_v44 = vpop.f32.mrf.mxu0 }
  0xc9   : > { %v558_v45 = vpack.c.bf16 %v542_v40, %v542_v40  ;;  %v470_v47 = vadd.f32 %v469_v17, %v420_v44  ;;  %582 = vst.msk [vmem:[%s949_s25 + $0x28] sm:$0xf] %vm571_vm3, %v565_v42  ;;  %v514_v48 = vmul.f32 %v934_v3, %v487_v43  ;;  %v496_v42 = vpop.f32.mrf.mxu3 }
  0xcb   : > { %575 = vst.msk [vmem:[%s949_s25 + $0xc] sm:$0xf] %vm571_vm3, %v558_v45  ;;  %v507_v49 = vmul.f32 %v934_v3, %v470_v47  ;;  %v534_v50 = vadd.f32 %v939_v6, %v514_v48 }
  0xcd   : > { %v527_v51 = vadd.f32 %v939_v6, %v507_v49  ;;  %v550_v53 = vmax.f32 %v534_v50, 0.0 }
  0xce   : > { %v476_v52 = vpop.f32.mrf.mxu1  ;;  %v440_v55 = vpop.f32.mrf.mxu2 }
  0xcf   : > { %v543_v54 = vmax.f32 %v527_v51, 0.0  ;;  %v566_v56 = vpack.c.bf16 %v550_v53, %v550_v53  ;;  %v490_v57 = vadd.f32 %v489_v46, %v440_v55 }
  0xd0   : > { %v422_v58 = vpop.f32.mrf.mxu0 }
  0xd1   : > { %v559_v59 = vpack.c.bf16 %v543_v54, %v543_v54  ;;  %v472_v60 = vadd.f32 %v471_v26, %v422_v58  ;;  %583 = vst.msk [vmem:[%s949_s25 + $0x2c] sm:$0xf] %vm571_vm3, %v566_v56  ;;  %v515_v61 = vmul.f32 %v934_v3, %v490_v57 }
  0xd3   : > { %576 = vst.msk [vmem:[%s949_s25 + $0x10] sm:$0xf] %vm571_vm3, %v559_v59  ;;  %v508_v63 = vmul.f32 %v934_v3, %v472_v60  ;;  %v535_v0 = vadd.f32 %v939_v6, %v515_v61 }
  0xd5   : > { %v528_v1 = vadd.f32 %v939_v6, %v508_v63  ;;  %v551_v4 = vmax.f32 %v535_v0, 0.0 }
  0xd6   : > { %v479_v2 = vpop.f32.mrf.mxu1  ;;  %v442_v8 = vpop.f32.mrf.mxu2 }
  0xd7   : > { %v480_v5 = vadd.f32 %v479_v2, %v944_v11  ;;  %v544_v7 = vmax.f32 %v528_v1, 0.0  ;;  %v567_v9 = vpack.c.bf16 %v551_v4, %v551_v4  ;;  %v492_v12 = vadd.f32 %v491_v62, %v442_v8 }
  0xd8   : > { %v425_v13 = vpop.f32.mrf.mxu0 }
  0xd9   : > { %v511_v10 = vmul.f32 %v934_v3, %v480_v5  ;;  %v560_v14 = vpack.c.bf16 %v544_v7, %v544_v7  ;;  %v475_v15 = vadd.f32 %v474_v38, %v425_v13  ;;  %584 = vst.msk [vmem:[%s949_s25 + $0x30] sm:$0xf] %vm571_vm3, %v567_v9  ;;  %v516_v17 = vmul.f32 %v934_v3, %v492_v12 }
  0xdb   : > { %v531_v16 = vadd.f32 %v939_v6, %v511_v10  ;;  %577 = vst.msk [vmem:[%s949_s25 + $0x14] sm:$0xf] %vm571_vm3, %v560_v14  ;;  %v509_v11 = vmul.f32 %v934_v3, %v475_v15  ;;  %v536_v19 = vadd.f32 %v939_v6, %v516_v17 }
  0xdd   : > { %v547_v18 = vmax.f32 %v531_v16, 0.0  ;;  %v529_v22 = vadd.f32 %v939_v6, %v509_v11  ;;  %v552_v25 = vmax.f32 %v536_v19, 0.0 }
  0xde   : > { %v481_v23 = vpop.f32.mrf.mxu1  ;;  %v445_v28 = vpop.f32.mrf.mxu2 }
  0xdf   : > { %v563_v24 = vpack.c.bf16 %v547_v18, %v547_v18  ;;  %v482_v26 = vadd.f32 %v481_v23, %v955_v20  ;;  %v545_v27 = vmax.f32 %v529_v22, 0.0  ;;  %v568_v29 = vpack.c.bf16 %v552_v25, %v552_v25 }
  0xe0   : > { %v495_v31 = vadd.f32 %v494_v21, %v445_v28  ;;  %v427_v32 = vpop.f32.mrf.mxu0 }
  0xe1   : > { %580 = vst.msk [vmem:[%s949_s25 + $0x20] sm:$0xf] %vm571_vm3, %v563_v24  ;;  %v512_v30 = vmul.f32 %v934_v3, %v482_v26  ;;  %v561_v33 = vpack.c.bf16 %v545_v27, %v545_v27  ;;  %v477_v34 = vadd.f32 %v476_v52, %v427_v32 }
  0xe2   : > { %585 = vst.msk [vmem:[%s949_s25 + $0x34] sm:$0xf] %vm571_vm3, %v568_v29  ;;  %v517_v36 = vmul.f32 %v934_v3, %v495_v31 }
  0xe3   : > { %v532_v35 = vadd.f32 %v939_v6, %v512_v30  ;;  %578 = vst.msk [vmem:[%s949_s25 + $0x18] sm:$0xf] %vm571_vm3, %v561_v33  ;;  %v510_v20 = vmul.f32 %v934_v3, %v477_v34 }
  0xe4   : > { %v537_v38 = vadd.f32 %v939_v6, %v517_v36 }
  0xe5   : > { %v548_v37 = vmax.f32 %v532_v35, 0.0  ;;  %v530_v39 = vadd.f32 %v939_v6, %v510_v20 }
  0xe6   : > { %v553_v41 = vmax.f32 %v537_v38, 0.0  ;;  %v447_v44 = vpop.f32.mrf.mxu2 }
  0xe7   : > { %v564_v40 = vpack.c.bf16 %v548_v37, %v548_v37  ;;  %v546_v43 = vmax.f32 %v530_v39, 0.0  ;;  %v497_v46 = vadd.f32 %v496_v42, %v447_v44 }
  0xe8   : > { %v569_v45 = vpack.c.bf16 %v553_v41, %v553_v41 }
  0xe9   : > { %581 = vst.msk [vmem:[%s949_s25 + $0x24] sm:$0xf] %vm571_vm3, %v564_v40  ;;  %v562_v47 = vpack.c.bf16 %v546_v43, %v546_v43  ;;  %v518_v48 = vmul.f32 %v934_v3, %v497_v46 }
  0xea   : > { %586 = vst.msk [vmem:[%s949_s25 + $0x38] sm:$0xf] %vm571_vm3, %v569_v45 }
  0xeb   : > { %579 = vst.msk [vmem:[%s949_s25 + $0x1c] sm:$0xf] %vm571_vm3, %v562_v47  ;;  %v538_v49 = vadd.f32 %v939_v6, %v518_v48 }
  0xed   : > { %v554_v50 = vmax.f32 %v538_v49, 0.0 }
  0xef   : > { %v570_v51 = vpack.c.bf16 %v554_v50, %v554_v50 }
  0xf1   : > { %587 = vst.msk [vmem:[%s949_s25 + $0x3c] sm:$0xf] %vm571_vm3, %v570_v51 }
  0xf2 PF: > { %s14_s15 = sadd.s32 1, %s817_s15  }
  0xf3   : > { %p11_p4 = scmp.ge.s32.totalorder %s14_s15, 6  }
  0xf5   :  { %13 = sbr.rel (!%p11_p4) target bundleno = 1 (0x1), region = 66 }

// kernel: visible_module_forward.3
= control target key start
LH: loop header
LB: loop body
LE: loop exit
PB: predicated region body
PF: predicated region fallthrough
CT: control target
= control target key end

     0   :  { %9 = vsyncpa [#allocation3], 0  ;;  %s1298_s0 = inlined_call_operand.vmem [shape: bf16[2,9,9,64], index: 0, kind: input, shape index: {}]   ;;  %s1299_s1 = inlined_call_operand.vmem [shape: bf16[2,9,9,64], index: 1, kind: input, shape index: {}]   ;;  %s1300_s2 = inlined_call_operand.vmem [shape: bf16[2,9,9,64], index: 2, kind: input, shape index: {}]   ;;  %s1301_s3 = inlined_call_operand.vmem [shape: bf16[2,9,9,64], index: 3, kind: input, shape index: {}]   ;;  %s1302_s4 = inlined_call_operand.hbm [shape: f32[2,8,8,64], index: 4, kind: output, shape index: {}]  }
   0x1   :  { %11 = vsyncpa [#allocation3 + $0x1], 0  ;;  %s1074_s15 = smov 0   ;;  %s1076_s16 = smov 0  }
   0x2   :  { %s1078_s17 = smov 0   ;;  %s1080_s18 = smov 0  }
   0x3 LB: > { %s1095_s19 = sadd.s32 4294967295, %s1045_s18   ;;  %s902_s20 = sadd.s32 4294967294, %s1045_s18   ;;  %s1045_s18 = sphi %s1080_s18, %s1308_s18   ;;  %s1041_s17 = sphi %s1078_s17, %s1307_s17   ;;  %s1037_s16 = sphi %s1076_s16, %s1306_s16   ;;  %s1033_s15 = sphi %s1074_s15, %s1305_s15  }
   0x4   : > { %s1099_s21 = sadd.s32 1, %s1045_s18   ;;  %s128_s22 = sadd.s32 1, %s1041_s17 }
   0x5   : > { %s125_s23 = ssub.s32 %s1045_s18, %s1099_s21  ;;  %p138_p0 = scmp.ne.s32.totalorder %s1041_s17, %s1037_s16 }
   0x6   : > { %p126_p1 = scmp.eq.s32.totalorder %s125_s23, 0  ;;  %p139_p2 = scmp.eq.s32.totalorder %s1095_s19, 1 }
   0x7   : > { %p144_p3 = scmp.ne.s32.totalorder %s1037_s16, %s1033_s15  ;;  %p145_p4 = scmp.eq.s32.totalorder %s902_s20, 1 }
   0x8   : > { %s1110_s24 = scalar_select %p126_p1, %s1041_s17, %s128_s22  }
   0x9   : > { %p1112_p5 = por %p139_p2, %p138_p0  ;;  %p1116_p6 = por %p145_p4, %p144_p3 }
   0xa   : > { %p905_p7 = scmp.ge.s32.totalorder %s1045_s18, 1  ;;  %p195_p8 = scmp.lt.s32.totalorder %s1045_s18, 3 }
   0xc   : > { %p196_p9 = pnand %p905_p7, %p195_p8 }
   0xd   : > { %p236_p10 = scmp.lt.s32.totalorder (!%p196_p9), %s1095_s19, 1  ;;  %s233_s20 = sand.u32 (!%p196_p9), 1, %s1037_s16  }
   0xe   : > { %199 = sbr.rel (%p196_p9) target bundleno = 99 (0x63), region = 36  ;;  %s1178_s22 = sshll.u32 (!%p196_p9), %s233_s20, 6 }
   0xf   : > { %s1188_s23 = scalar_lea.vmem (!%p196_p9), [#allocation2], %s1178_s22 }
  0x13   : > { %s237_s27 = scalar_select %p236_p10, %s1095_s19, 1  ;;  %vm474_vm0 = vcmask 1046528   ;;  %vm779_vm1 = vcmask 523264  }
  0x15   : > { %s941_s28 = smul.u32 72, %s237_s27  ;;  %s940_s27 = sshll.u32 %s1095_s19, 6 }
  0x16   : > { %s800_s30 = scalar_lea.hbm %s1302_s4, %s940_s27  ;;  %s789_s19 = scalar_lea.sflag [#allocation3], %s233_s20 }
  0x17   : > { %s1127_s5 = scalar_lea.vmem %s1298_s0, %s941_s28  ;;  %s1132_s8 = scalar_lea.vmem %s1299_s1, %s941_s28 }
  0x18   : > { %s1137_s11 = scalar_lea.vmem %s1300_s2, %s941_s28  ;;  %s1142_s14 = scalar_lea.vmem %s1301_s3, %s941_s28  ;;  %v256_v0 = vld [vmem:[%s1127_s5] sm:$0xf]  ;;  %v272_v2 = vld [vmem:[%s1127_s5 + $0x4] sm:$0x1]  ;;  %v911_v8 = vld [vmem:[%s1127_s5 + $0x8] sm:$0xf] }
  0x19   : > { %v264_v1 = vld [vmem:[%s1132_s8] sm:$0xf]  ;;  %v296_v5 = vld [vmem:[%s1137_s11 + $0x4] sm:$0x1]  ;;  %v330_v6 = vunpack.c.l.bf16 %v256_v0  ;;  %v919_v9 = vld [vmem:[%s1132_s8 + $0x8] sm:$0xf]  ;;  %v362_v11 = vunpack.c.l.bf16 %v272_v2  ;;  %v595_v16 = vunpack.c.l.bf16 %v911_v8 }
  0x1a   : > { %v280_v3 = vld [vmem:[%s1137_s11] sm:$0xf]  ;;  %v338_v7 = vunpack.c.l.bf16 %v264_v1  ;;  %v927_v10 = vld [vmem:[%s1127_s5 + $0xc] sm:$0x1]  ;;  %v531_v14 = vunpack.c.l.bf16 %v296_v5  ;;  %v603_v17 = vunpack.c.l.bf16 %v919_v9  ;;  %v257_v19 = vld [vmem:[%s1127_s5 + $0x8] sm:$0xf] }
  0x1b   : > { %v288_v4 = vld [vmem:[%s1142_s14] sm:$0xf]  ;;  %v370_v12 = vunpack.c.l.bf16 %v280_v3  ;;  %v699_v18 = vunpack.c.l.bf16 %v927_v10  ;;  %v265_v20 = vld [vmem:[%s1132_s8 + $0x8] sm:$0xf]  ;;  %v273_v21 = vld [vmem:[%s1127_s5 + $0xc] sm:$0x1]  ;;  %v331_v26 = vunpack.c.l.bf16 %v257_v19 }
  0x1c   : > { %v523_v13 = vunpack.c.l.bf16 %v288_v4  ;;  %v346_v15 = vmax.f32 %v330_v6, %v338_v7  ;;  %v548_v24 = vrot.slane %v531_v14, 1  ;;  %v281_v25 = vld [vmem:[%s1137_s11 + $0x8] sm:$0xf]  ;;  %v611_v27 = vmax.f32 %v595_v16, %v603_v17  ;;  %v297_v31 = vld [vmem:[%s1137_s11 + $0xc] sm:$0x1]  ;;  %s803_s6 = sshll.u32 %s800_s30, 4  ;;  %s804_s6 = int_to_ptr.hbm [resolvable:$true] %s803_s6 }
  0x1d   : > { %v386_v22 = vrot.slane %v370_v12, 7  ;;  %v547_v23 = vrot.slane %v370_v12, 1  ;;  %v723_v28 = vrot.slane %v595_v16, 1  ;;  %v724_v29 = vrot.slane %v699_v18, 1  ;;  %v289_v30 = vld [vmem:[%s1142_s14 + $0x8] sm:$0xf] }
  0x1e   : > { %v339_v32 = vunpack.c.l.bf16 %v265_v20  ;;  %v912_v36 = vld [vmem:[%s1127_s5 + $0x10] sm:$0xf]  ;;  %v363_v37 = vunpack.c.l.bf16 %v273_v21  ;;  %v928_v41 = vld [vmem:[%s1127_s5 + $0x14] sm:$0x1]  ;;  %v371_v43 = vunpack.c.l.bf16 %v281_v25  ;;  %v524_v46 = vunpack.c.l.bf16 %v289_v30  ;;  %v921_v12 = vld [vmem:[%s1132_s8 + $0x18] sm:$0xf] }
  0x1f   : > { %v402_v33 = vmax.f32 %v330_v6, %v386_v22  ;;  %v403_v34 = vmax.f32 %v362_v11, %v386_v22  ;;  %v549_v35 = vsel %vm474_vm0, %v547_v23, %v548_v24  ;;  %v725_v39 = vsel %vm474_vm0, %v723_v28, %v724_v29  ;;  %v920_v40 = vld [vmem:[%s1132_s8 + $0x10] sm:$0xf]  ;;  %v274_v62 = vld [vmem:[%s1127_s5 + $0x14] sm:$0x1]  ;;  %v913_v11 = vld [vmem:[%s1127_s5 + $0x18] sm:$0xf] }
  0x20   : > { %v579_v38 = vmax.f32 %v523_v13, %v549_v35  ;;  %v347_v42 = vmax.f32 %v331_v26, %v339_v32  ;;  %v532_v47 = vunpack.c.l.bf16 %v297_v31  ;;  %v387_v49 = vrot.slane %v371_v43, 7  ;;  %v258_v52 = vld [vmem:[%s1127_s5 + $0x10] sm:$0xf]  ;;  %v298_v9 = vld [vmem:[%s1137_s11 + $0x14] sm:$0x1]  ;;  %s997_s7 = sshra.s32 %s804_s6, 4  ;;  %s998_s7 = int_to_ptr.hbm [resolvable:$true] %s997_s7 }
  0x21   : > { %v475_v44 = vrot.slane %v402_v33, 1  ;;  %v476_v45 = vrot.slane %v403_v34, 1  ;;  %v550_v50 = vrot.slane %v371_v43, 1  ;;  %v596_v51 = vunpack.c.l.bf16 %v912_v36  ;;  %v266_v57 = vld [vmem:[%s1132_s8 + $0x10] sm:$0xf]  ;;  %p1004_p0 = scmp.lt.s32.totalorder %s998_s7, %s1302_s4 }
  0x22   : > { %v643_v48 = vmax.f32 %v579_v38, %v611_v27  ;;  %v551_v54 = vrot.slane %v532_v47, 1  ;;  %v604_v55 = vunpack.c.l.bf16 %v920_v40  ;;  %v700_v56 = vunpack.c.l.bf16 %v928_v41  ;;  %v282_v63 = vld [vmem:[%s1137_s11 + $0x10] sm:$0xf]  ;;  %v929_v21 = vld [vmem:[%s1127_s5 + $0x1c] sm:$0x1] }
  0x23   : > { %v477_v53 = vsel %vm474_vm0, %v475_v44, %v476_v45  ;;  %v404_v59 = vmax.f32 %v331_v26, %v387_v49  ;;  %v405_v60 = vmax.f32 %v363_v37, %v387_v49  ;;  %v726_v61 = vrot.slane %v596_v51, 1  ;;  %v290_v3 = vld [vmem:[%s1142_s14 + $0x10] sm:$0xf]  ;;  %v259_v33 = vld [vmem:[%s1127_s5 + $0x18] sm:$0xf] }
  0x24   : > { %v507_v58 = vmax.f32 %v346_v15, %v477_v53  ;;  %v552_v0 = vsel %vm474_vm0, %v550_v50, %v551_v54  ;;  %v612_v1 = vmax.f32 %v596_v51, %v604_v55  ;;  %v727_v2 = vrot.slane %v700_v56, 1  ;;  %v275_v38 = vld [vmem:[%s1127_s5 + $0x1c] sm:$0x1]  ;;  %v267_v44 = vld [vmem:[%s1132_s8 + $0x18] sm:$0xf] }
  0x25   : > { %v332_v4 = vunpack.c.l.bf16 %v258_v52  ;;  %v478_v6 = vrot.slane %v404_v59, 1  ;;  %v479_v7 = vrot.slane %v405_v60, 1  ;;  %v580_v8 = vmax.f32 %v524_v46, %v552_v0  ;;  %v291_v47 = vld [vmem:[%s1142_s14 + $0x18] sm:$0xf]  ;;  %v914_v52 = vld [vmem:[%s1127_s5 + $0x20] sm:$0xf] }
  0x26   : > { %v675_v5 = vmax.f32 %v507_v58, %v643_v48  ;;  %v728_v10 = vsel %vm474_vm0, %v726_v61, %v727_v2  ;;  %v340_v13 = vunpack.c.l.bf16 %v266_v57  ;;  %v364_v14 = vunpack.c.l.bf16 %v274_v62  ;;  %v299_v48 = vld [vmem:[%s1137_s11 + $0x1c] sm:$0x1]  ;;  %v922_v53 = vld [vmem:[%s1132_s8 + $0x20] sm:$0xf]  ;;  %v930_v59 = vld [vmem:[%s1127_s5 + $0x24] sm:$0x1] }
  0x27   : > { %v372_v15 = vunpack.c.l.bf16 %v282_v63  ;;  %v480_v17 = vsel %vm474_vm0, %v478_v6, %v479_v7  ;;  %v644_v18 = vmax.f32 %v580_v8, %v612_v1  ;;  %v525_v19 = vunpack.c.l.bf16 %v290_v3 }
  0x28   : > { %v755_v16 = vmax.f32 %v675_v5, %v725_v39  ;;  %v508_v20 = vmax.f32 %v347_v42, %v480_v17  ;;  %v348_v22 = vmax.f32 %v332_v4, %v340_v13  ;;  %v533_v24 = vunpack.c.l.bf16 %v298_v9  ;;  %v283_v39 = vld [vmem:[%s1137_s11 + $0x18] sm:$0xf]  ;;  %v260_v9 = vld [vmem:[%s1127_s5 + $0x20] sm:$0xf] }
  0x29   : > { %v388_v23 = vrot.slane %v372_v15, 7  ;;  %v553_v26 = vrot.slane %v372_v15, 1  ;;  %v597_v27 = vunpack.c.l.bf16 %v913_v11  ;;  %v605_v28 = vunpack.c.l.bf16 %v921_v12  ;;  %v276_v15 = vld [vmem:[%s1127_s5 + $0x24] sm:$0x1] }
  0x2a   : > { %v763_v25 = vpack.c.bf16 %v755_v16, %v755_v16  ;;  %v676_v29 = vmax.f32 %v508_v20, %v644_v18  ;;  %v554_v32 = vrot.slane %v533_v24, 1  ;;  %v701_v36 = vunpack.c.l.bf16 %v929_v21  ;;  %v284_v16 = vld [vmem:[%s1137_s11 + $0x20] sm:$0xf]  ;;  %v300_v24 = vld [vmem:[%s1137_s11 + $0x24] sm:$0x1] }
  0x2b   : > { %v406_v30 = vmax.f32 %v332_v4, %v388_v23  ;;  %v407_v31 = vmax.f32 %v364_v14, %v388_v23  ;;  %v613_v35 = vmax.f32 %v597_v27, %v605_v28  ;;  %v729_v37 = vrot.slane %v597_v27, 1  ;;  %v292_v21 = vld [vmem:[%s1142_s14 + $0x20] sm:$0xf] }
  0x2c   : > { %v771_v34 = vunpack.c.l.bf16 %v763_v25  ;;  %v756_v40 = vmax.f32 %v676_v29, %v728_v10  ;;  %v555_v43 = vsel %vm474_vm0, %v553_v26, %v554_v32  ;;  %v730_v46 = vrot.slane %v701_v36, 1  ;;  %v268_v10 = vld [vmem:[%s1132_s8 + $0x20] sm:$0xf]  ;;  %v915_v25 = vld [vmem:[%s1127_s5 + $0x28] sm:$0xf] }
  0x2d   : > { %v481_v41 = vrot.slane %v406_v30, 1  ;;  %v482_v42 = vrot.slane %v407_v31, 1  ;;  %v581_v45 = vmax.f32 %v525_v19, %v555_v43  ;;  %v333_v49 = vunpack.c.l.bf16 %v259_v33  ;;  %v923_v30 = vld [vmem:[%s1132_s8 + $0x28] sm:$0xf]  ;;  %v931_v31 = vld [vmem:[%s1127_s5 + $0x2c] sm:$0x1] }
  0x2e   : > { %780 = vst.msk [vmem:[%s1188_s23] sm:$0xff] %vm779_vm1, %v771_v34  ;;  %v764_v50 = vpack.c.bf16 %v756_v40, %v756_v40  ;;  %v365_v54 = vunpack.c.l.bf16 %v275_v38  ;;  %v373_v55 = vunpack.c.l.bf16 %v283_v39  ;;  %v731_v58 = vsel %vm474_vm0, %v729_v37, %v730_v46 }
  0x2f   : > { %v483_v51 = vsel %vm474_vm0, %v481_v41, %v482_v42  ;;  %v645_v57 = vmax.f32 %v581_v45, %v613_v35  ;;  %v341_v60 = vunpack.c.l.bf16 %v267_v44  ;;  %v526_v63 = vunpack.c.l.bf16 %v291_v47  ;;  %v261_v42 = vld [vmem:[%s1127_s5 + $0x28] sm:$0xf] }
  0x30   : > { %v509_v56 = vmax.f32 %v348_v22, %v483_v51  ;;  %v772_v61 = vunpack.c.l.bf16 %v764_v50  ;;  %v389_v62 = vrot.slane %v373_v55, 7  ;;  %v534_v0 = vunpack.c.l.bf16 %v299_v48  ;;  %v269_v47 = vld [vmem:[%s1132_s8 + $0x28] sm:$0xf] }
  0x31   : > { %v556_v2 = vrot.slane %v373_v55, 1  ;;  %v598_v3 = vunpack.c.l.bf16 %v914_v52  ;;  %v606_v4 = vunpack.c.l.bf16 %v922_v53  ;;  %v702_v8 = vunpack.c.l.bf16 %v930_v59  ;;  %v277_v52 = vld [vmem:[%s1127_s5 + $0x2c] sm:$0x1]  ;;  %v285_v53 = vld [vmem:[%s1137_s11 + $0x28] sm:$0xf] }
  0x32   : > { %v677_v1 = vmax.f32 %v509_v56, %v645_v57  ;;  %781 = vst.msk [vmem:[%s1188_s23 + $0x8] sm:$0xff] %vm779_vm1, %v772_v61  ;;  %v408_v5 = vmax.f32 %v333_v49, %v389_v62  ;;  %v409_v6 = vmax.f32 %v365_v54, %v389_v62  ;;  %v557_v7 = vrot.slane %v534_v0, 1  ;;  %v293_v57 = vld [vmem:[%s1142_s14 + $0x28] sm:$0xf] }
  0x33   : > { %v349_v12 = vmax.f32 %v333_v49, %v341_v60  ;;  %v614_v13 = vmax.f32 %v598_v3, %v606_v4  ;;  %v732_v14 = vrot.slane %v598_v3, 1  ;;  %v733_v20 = vrot.slane %v702_v8, 1  ;;  %v924_v4 = vld [vmem:[%s1132_s8 + $0x30] sm:$0xf] }
  0x34   : > { %v757_v11 = vmax.f32 %v677_v1, %v731_v58  ;;  %v484_v17 = vrot.slane %v408_v5, 1  ;;  %v485_v18 = vrot.slane %v409_v6, 1  ;;  %v558_v19 = vsel %vm474_vm0, %v556_v2, %v557_v7  ;;  %v301_v58 = vld [vmem:[%s1137_s11 + $0x2c] sm:$0x1]  ;;  %v932_v7 = vld [vmem:[%s1127_s5 + $0x34] sm:$0x1] }
  0x35   : > { %v582_v23 = vmax.f32 %v526_v63, %v558_v19  ;;  %v334_v26 = vunpack.c.l.bf16 %v260_v9  ;;  %v342_v27 = vunpack.c.l.bf16 %v268_v10  ;;  %v734_v29 = vsel %vm474_vm0, %v732_v14, %v733_v20  ;;  %v916_v63 = vld [vmem:[%s1127_s5 + $0x30] sm:$0xf] }
  0x36   : > { %v765_v22 = vpack.c.bf16 %v757_v11, %v757_v11  ;;  %v486_v28 = vsel %vm474_vm0, %v484_v17, %v485_v18  ;;  %v366_v32 = vunpack.c.l.bf16 %v276_v15  ;;  %v374_v33 = vunpack.c.l.bf16 %v284_v16  ;;  %v262_v19 = vld [vmem:[%s1127_s5 + $0x30] sm:$0xf] }
  0x37   : > { %v510_v35 = vmax.f32 %v349_v12, %v486_v28  ;;  %v646_v36 = vmax.f32 %v582_v23, %v614_v13  ;;  %v527_v37 = vunpack.c.l.bf16 %v292_v21  ;;  %v535_v39 = vunpack.c.l.bf16 %v300_v24  ;;  %v278_v24 = vld [vmem:[%s1127_s5 + $0x34] sm:$0x1] }
  0x38   : > { %v773_v34 = vunpack.c.l.bf16 %v765_v22  ;;  %v390_v38 = vrot.slane %v374_v33, 7  ;;  %v559_v40 = vrot.slane %v374_v33, 1  ;;  %v599_v41 = vunpack.c.l.bf16 %v915_v25  ;;  %v286_v25 = vld [vmem:[%s1137_s11 + $0x30] sm:$0xf] }
  0x39   : > { %v678_v43 = vmax.f32 %v510_v35, %v646_v36  ;;  %v350_v44 = vmax.f32 %v334_v26, %v342_v27  ;;  %v607_v45 = vunpack.c.l.bf16 %v923_v30  ;;  %v703_v46 = vunpack.c.l.bf16 %v931_v31  ;;  %v270_v30 = vld [vmem:[%s1132_s8 + $0x30] sm:$0xf]  ;;  %v302_v35 = vld [vmem:[%s1137_s11 + $0x34] sm:$0x1] }
  0x3a   : > { %782 = vst.msk [vmem:[%s1188_s23 + $0x10] sm:$0xff] %vm779_vm1, %v773_v34  ;;  %v410_v48 = vmax.f32 %v334_v26, %v390_v38  ;;  %v411_v49 = vmax.f32 %v366_v32, %v390_v38  ;;  %v560_v50 = vrot.slane %v535_v39, 1  ;;  %v735_v51 = vrot.slane %v599_v41, 1  ;;  %v294_v34 = vld [vmem:[%s1142_s14 + $0x30] sm:$0xf] }
  0x3b   : > { %v758_v54 = vmax.f32 %v678_v43, %v734_v29  ;;  %v615_v55 = vmax.f32 %v599_v41, %v607_v45  ;;  %v736_v56 = vrot.slane %v703_v46, 1  ;;  %v335_v59 = vunpack.c.l.bf16 %v261_v42  ;;  %v917_v39 = vld [vmem:[%s1127_s5 + $0x38] sm:$0xf] }
  0x3c   : > { %v487_v60 = vrot.slane %v410_v48, 1  ;;  %v488_v61 = vrot.slane %v411_v49, 1  ;;  %v561_v62 = vsel %vm474_vm0, %v559_v40, %v560_v50  ;;  %v343_v0 = vunpack.c.l.bf16 %v269_v47  ;;  %v925_v45 = vld [vmem:[%s1132_s8 + $0x38] sm:$0xf]  ;;  %v933_v48 = vld [vmem:[%s1127_s5 + $0x3c] sm:$0x1] }
  0x3d   : > { %v766_v1 = vpack.c.bf16 %v758_v54, %v758_v54  ;;  %v583_v2 = vmax.f32 %v527_v37, %v561_v62  ;;  %v737_v3 = vsel %vm474_vm0, %v735_v51, %v736_v56  ;;  %v367_v5 = vunpack.c.l.bf16 %v277_v52 }
  0x3e   : > { %v489_v6 = vsel %vm474_vm0, %v487_v60, %v488_v61  ;;  %v375_v8 = vunpack.c.l.bf16 %v285_v53  ;;  %v528_v9 = vunpack.c.l.bf16 %v293_v57  ;;  %v536_v10 = vunpack.c.l.bf16 %v301_v58  ;;  %v263_v60 = vld [vmem:[%s1127_s5 + $0x38] sm:$0xf] }
  0x3f   : > { %v774_v11 = vunpack.c.l.bf16 %v766_v1  ;;  %v511_v12 = vmax.f32 %v350_v44, %v489_v6  ;;  %v647_v13 = vmax.f32 %v583_v2, %v615_v55  ;;  %v600_v14 = vunpack.c.l.bf16 %v916_v63  ;;  %v271_v61 = vld [vmem:[%s1132_s8 + $0x38] sm:$0xf]  ;;  %v279_v2 = vld [vmem:[%s1127_s5 + $0x3c] sm:$0x1] }
  0x40   : > { %v391_v15 = vrot.slane %v375_v8, 7  ;;  %v562_v16 = vrot.slane %v375_v8, 1  ;;  %v563_v17 = vrot.slane %v536_v10, 1  ;;  %v608_v18 = vunpack.c.l.bf16 %v924_v4  ;;  %v295_v8 = vld [vmem:[%s1142_s14 + $0x38] sm:$0xf] }
  0x41   : > { %783 = vst.msk [vmem:[%s1188_s23 + $0x18] sm:$0xff] %vm779_vm1, %v774_v11  ;;  %v679_v20 = vmax.f32 %v511_v12, %v647_v13  ;;  %v351_v21 = vmax.f32 %v335_v59, %v343_v0  ;;  %v704_v22 = vunpack.c.l.bf16 %v932_v7  ;;  %v738_v23 = vrot.slane %v600_v14, 1  ;;  %v303_v12 = vld [vmem:[%s1137_s11 + $0x3c] sm:$0x1] }
  0x42   : > { %v412_v26 = vmax.f32 %v335_v59, %v391_v15  ;;  %v413_v27 = vmax.f32 %v367_v5, %v391_v15  ;;  %v564_v28 = vsel %vm474_vm0, %v562_v16, %v563_v17  ;;  %v616_v29 = vmax.f32 %v600_v14, %v608_v18  ;;  %v918_v15 = vld [vmem:[%s1127_s5 + $0x40] sm:$0xf] }
  0x43   : > { %v759_v31 = vmax.f32 %v679_v20, %v737_v3  ;;  %v584_v32 = vmax.f32 %v528_v9, %v564_v28  ;;  %v739_v33 = vrot.slane %v704_v22, 1  ;;  %v336_v36 = vunpack.c.l.bf16 %v262_v19  ;;  %v287_v3 = vld [vmem:[%s1137_s11 + $0x38] sm:$0xf]  ;;  %v926_v16 = vld [vmem:[%s1132_s8 + $0x40] sm:$0xf]  ;;  %s999_s8 = scalar_lea.hbm %s998_s7, 64 }
  0x44   : > { %v490_v37 = vrot.slane %v412_v26, 1  ;;  %v491_v38 = vrot.slane %v413_v27, 1  ;;  %v368_v40 = vunpack.c.l.bf16 %v278_v24  ;;  %v376_v41 = vunpack.c.l.bf16 %v286_v25  ;;  %p1000_p11 = scmp.ne.s32.totalorder %s998_s7, %s999_s8  ;;  %s1003_s11 = scalar_lea.hbm %s1302_s4, 128 }
  0x45   : > { %v767_v42 = vpack.c.bf16 %v759_v31, %v759_v31  ;;  %v648_v43 = vmax.f32 %v584_v32, %v616_v29  ;;  %v740_v44 = vsel %vm474_vm0, %v738_v23, %v739_v33  ;;  %v344_v46 = vunpack.c.l.bf16 %v270_v30  ;;  %v934_v23 = vld [vmem:[%s1127_s5 + $0x44] sm:$0x1]  ;;  %s801_s5 = sshll.u32 %s1188_s23, 4  ;;  %p1005_p1 = scmp.lt.s32.totalorder %s1003_s11, %s999_s8  ;;  %s802_s5 = int_to_ptr.vmem [resolvable:$true] %s801_s5 }
  0x46   : > { %v492_v47 = vsel %vm474_vm0, %v490_v37, %v491_v38  ;;  %v392_v49 = vrot.slane %v376_v41, 7  ;;  %v529_v50 = vunpack.c.l.bf16 %v294_v34  ;;  %v537_v51 = vunpack.c.l.bf16 %v302_v35  ;;  %p1001_p12 = pnand %p1000_p11, %p1112_p5 }
  0x47   : > { %v775_v52 = vunpack.c.l.bf16 %v767_v42  ;;  %v512_v53 = vmax.f32 %v351_v21, %v492_v47  ;;  %v565_v54 = vrot.slane %v376_v41, 1  ;;  %v601_v55 = vunpack.c.l.bf16 %v917_v39  ;;  %p1006_p2 = por %p1005_p1, %p1004_p0 }
  0x48   : > { %v414_v56 = vmax.f32 %v336_v36, %v392_v49  ;;  %v415_v57 = vmax.f32 %v368_v40, %v392_v49  ;;  %v566_v58 = vrot.slane %v537_v51, 1  ;;  %v609_v59 = vunpack.c.l.bf16 %v925_v45  ;;  %p1002_p13 = pneg %p1001_p12 }
  0x49   : > { %784 = vst.msk [vmem:[%s1188_s23 + $0x20] sm:$0xff] %vm779_vm1, %v775_v52  ;;  %v680_v62 = vmax.f32 %v512_v53, %v648_v43  ;;  %v352_v63 = vmax.f32 %v336_v36, %v344_v46  ;;  %v705_v0 = vunpack.c.l.bf16 %v933_v48  ;;  %v741_v1 = vrot.slane %v601_v55, 1 }
  0x4a   : > { %v493_v4 = vrot.slane %v414_v56, 1  ;;  %v494_v5 = vrot.slane %v415_v57, 1  ;;  %v567_v6 = vsel %vm474_vm0, %v565_v54, %v566_v58  ;;  %v617_v7 = vmax.f32 %v601_v55, %v609_v59  ;;  %p1007_p3 = pnand %p1006_p2, %p1002_p13 }
  0x4b   : > { %v760_v9 = vmax.f32 %v680_v62, %v740_v44  ;;  %v585_v10 = vmax.f32 %v529_v50, %v567_v6  ;;  %v742_v11 = vrot.slane %v705_v0, 1  ;;  %v337_v13 = vunpack.c.l.bf16 %v263_v60 }
  0x4c   : > { %v495_v14 = vsel %vm474_vm0, %v493_v4, %v494_v5  ;;  %v345_v17 = vunpack.c.l.bf16 %v271_v61  ;;  %v369_v18 = vunpack.c.l.bf16 %v279_v2  ;;  %v377_v19 = vunpack.c.l.bf16 %v287_v3 }
  0x4d   : > { %v768_v20 = vpack.c.bf16 %v760_v9, %v760_v9  ;;  %v513_v21 = vmax.f32 %v352_v63, %v495_v14  ;;  %v649_v22 = vmax.f32 %v585_v10, %v617_v7  ;;  %v530_v24 = vunpack.c.l.bf16 %v295_v8 }
  0x4e   : > { %v743_v25 = vsel %vm474_vm0, %v741_v1, %v742_v11  ;;  %v393_v26 = vrot.slane %v377_v19, 7  ;;  %v538_v27 = vunpack.c.l.bf16 %v303_v12  ;;  %v568_v28 = vrot.slane %v377_v19, 1 }
  0x4f   : > { %v776_v29 = vunpack.c.l.bf16 %v768_v20  ;;  %v681_v30 = vmax.f32 %v513_v21, %v649_v22  ;;  %v602_v31 = vunpack.c.l.bf16 %v918_v15  ;;  %v610_v32 = vunpack.c.l.bf16 %v926_v16 }
  0x50   : > { %v416_v33 = vmax.f32 %v337_v13, %v393_v26  ;;  %v417_v34 = vmax.f32 %v369_v18, %v393_v26  ;;  %v569_v35 = vrot.slane %v538_v27, 1  ;;  %v706_v36 = vunpack.c.l.bf16 %v934_v23 }
  0x51   : > { %785 = vst.msk [vmem:[%s1188_s23 + $0x28] sm:$0xff] %vm779_vm1, %v776_v29  ;;  %v761_v37 = vmax.f32 %v681_v30, %v743_v25  ;;  %v353_v38 = vmax.f32 %v337_v13, %v345_v17  ;;  %v618_v39 = vmax.f32 %v602_v31, %v610_v32  ;;  %v744_v40 = vrot.slane %v602_v31, 1 }
  0x52   : > { %v496_v41 = vrot.slane %v416_v33, 1  ;;  %v497_v42 = vrot.slane %v417_v34, 1  ;;  %v570_v43 = vsel %vm474_vm0, %v568_v28, %v569_v35  ;;  %v745_v44 = vrot.slane %v706_v36, 1 }
  0x53   : > { %v769_v45 = vpack.c.bf16 %v761_v37, %v761_v37  ;;  %v586_v46 = vmax.f32 %v530_v24, %v570_v43 }
  0x54   : > { %v498_v47 = vsel %vm474_vm0, %v496_v41, %v497_v42  ;;  %v746_v51 = vsel %vm474_vm0, %v744_v40, %v745_v44 }
  0x55   : > { %v777_v48 = vunpack.c.l.bf16 %v769_v45  ;;  %v514_v49 = vmax.f32 %v353_v38, %v498_v47  ;;  %v650_v50 = vmax.f32 %v586_v46, %v618_v39 }
  0x57   : > { %786 = vst.msk [vmem:[%s1188_s23 + $0x30] sm:$0xff] %vm779_vm1, %v777_v48  ;;  %v682_v52 = vmax.f32 %v514_v49, %v650_v50 }
  0x59   : > { %v762_v53 = vmax.f32 %v682_v52, %v746_v51 }
  0x5b   : > { %v770_v54 = vpack.c.bf16 %v762_v53, %v762_v53 }
  0x5d   : > { %v778_v55 = vunpack.c.l.bf16 %v770_v54 }
  0x5f   : > { %787 = vst.msk [vmem:[%s1188_s23 + $0x38] sm:$0xff] %vm779_vm1, %v778_v55 }
  0x60   : > { %1010 = shalt.err (!%p1007_p3)
}
  0x61   : > { %s1047_s14 = smov 128   ;;  %s1048_s20 = smov 8  }
  0x62   : > { %942 = dma.vmem_to_hbm [thread:$0]  (%p1112_p5), %s802_s5, 1024, %s804_s6, %s789_s19, %s1047_s14, %s1047_s14, %s1048_s20  }
  0x63 PF: > { %p948_p4 = scmp.ge.s32.totalorder %s1045_s18, 2  ;;  %s818_s22 = sand.u32 1, %s1033_s15  }
  0x64   : > { %s819_s23 = scalar_lea.sflag [#allocation3], %s818_s22 }
  0x65   : > { %p945_p7 = pnand %p948_p4, %p1116_p6 }
  0x67   : > { %p946_p8 = pneg %p945_p7 }
  0x69   : > { %1028 = dma.done.wait (%p946_p8), %s819_s23, 1024  }
  0x6a   : > { %1030 = vsyncadd (%p946_p8), %s819_s23, 4294966272  ;;  %p14_p9 = scmp.ge.s32.totalorder %s1099_s21, 4   ;;  %s1305_s15 = smov %s1037_s16 }
  0x6b   : > { %s1306_s16 = smov %s1041_s17  ;;  %s1307_s17 = smov %s1110_s24 }
  0x6c   : > { %s1308_s18 = smov %s1099_s21  ;;  %16 = sbr.rel (!%p14_p9) target bundleno = 3 (0x3), region = 82 }
  0x71   :  { %825 = vsyncpa [#allocation3], 1 }
  0x72   :  { %827 = vsyncpa [#allocation3 + $0x1], 1 }

</bundles_post_ra>
